<compile_context>
chip_gen: v5e
topology: v5e:2x2
jax: 0.10.0
libtpu: 0.0.40
codegen_flags: <defaults>
</compile_context>

<pallas_src>
import functools

import jax
import jax.numpy as jnp
from jax.experimental import pallas as pl
from jax.experimental.pallas import tpu as pltpu


def _round_up(x, m):
    return ((x + m - 1) // m) * m


# ----------------------------------------------------------------------------
# Pallas kernel: K-tiled matmul accumulate + controller injection + renorm.
# ----------------------------------------------------------------------------
def _wrapped_block_kernel(x_ref, w_ref, ctrl_ref, mask_ref, out_ref, acc_ref,
                          *, operator: str, normalize: bool):
    k = pl.program_id(1)

    @pl.when(k == 0)
    def _init():
        acc_ref[...] = jnp.zeros_like(acc_ref)

    # MXU matmul on the (tm, tk) x (tk, H) tiles, accumulated in f32.
    acc_ref[...] += jnp.dot(x_ref[...], w_ref[...],
                            preferred_element_type=jnp.float32)

    @pl.when(k == pl.num_programs(1) - 1)
    def _epilogue():
        y = acc_ref[...]                                 # (tm, H), f32
        ctrl = ctrl_ref[...].astype(jnp.float32)         # (1, H)
        mask = mask_ref[...].astype(jnp.float32)         # (tm, 1), binary

        need_dot = (operator == "piecewise_linear") or normalize
        if need_dot:
            dot = jnp.sum(y * ctrl, axis=-1, keepdims=True)   # (tm, 1)

        # Per-row scalar s such that mod = y + s * ctrl.
        if operator == "linear_comb":
            s = mask
        elif operator == "piecewise_linear":
            # sign(sum(y * ctrl * mask)) == mask * sign(sum(y * ctrl)) for the
            # binary position-id mask; avoids materializing ctrl*mask.
            s = mask * jnp.sign(dot)
        else:
            raise NotImplementedError(f"Operator {operator} not implemented.")

        mod = y + ctrl * s

        if normalize:
            # Analytic post-norm: ||y + s*ctrl||^2 = ||y||^2 + 2 s <y,ctrl>
            #                                        + s^2 ||ctrl||^2.
            sumsq_pre = jnp.sum(y * y, axis=-1, keepdims=True)        # (tm,1)
            ctrl_sq = jnp.sum(ctrl * ctrl, axis=-1, keepdims=True)    # (1,1)
            sumsq_post = sumsq_pre + 2.0 * s * dot + (s * s) * ctrl_sq
            # norm_pre / norm_post, with the reciprocal-sqrt on the EUP.
            scale = jnp.sqrt(sumsq_pre) * jax.lax.rsqrt(sumsq_post)
            mod = mod * scale

        out_ref[...] = mod.astype(out_ref.dtype)


# ----------------------------------------------------------------------------
# Tile selection against the chip's physical VMEM.
# ----------------------------------------------------------------------------
def _vmem_capacity_bytes():
    try:
        info = pltpu.get_tpu_info()
        cap = int(getattr(info, "vmem_capacity_bytes", 0))
        if cap > 0:
            return cap
    except Exception:
        pass
    return 64 * 1024 * 1024   # conservative fallback (v7x-sized)


def _resident_bytes(tm, tk, H, compute_itemsize, out_itemsize):
    # Double-buffered x / w / out tiles + f32 accumulator + small operands.
    return (2 * (tm * tk + tk * H) * compute_itemsize
            + 2 * tm * H * out_itemsize
            + tm * H * 4
            + 2 * (tm + H) * 4)


def _select_tiles(M, Din, H, compute_itemsize, out_itemsize, vmem_cap,
                  tk_default=512):
    # --- K tile ---
    if Din % tk_default == 0:
        tk, din_pad = tk_default, Din
    elif Din <= tk_default:
        tk, din_pad = Din, Din                    # single full-extent K step
    else:
        din_pad = _round_up(Din, tk_default)      # zero-pad K in the wrapper
        tk = tk_default

    # --- Row tile: largest candidate fitting ~85% of physical VMEM ---
    budget = int(0.85 * vmem_cap)
    tm = 8
    for cand in (1024, 768, 512, 384, 256, 128, 64, 32, 16, 8):
        if _resident_bytes(cand, tk, H, compute_itemsize, out_itemsize) <= budget:
            tm = cand
            break
    tm = min(tm, _round_up(M, 8))                 # don't over-pad tiny M
    m_pad = _round_up(M, tm)
    return tm, tk, m_pad, din_pad


# ----------------------------------------------------------------------------
# Wrapper: pad/flatten, cast to compute dtype, call the kernel, slice back.
# ----------------------------------------------------------------------------
def wrapped_block_forward(x, w, controller, mask,
                          *, operator="linear_comb", normalize=False,
                          compute_dtype=jnp.bfloat16):
    """One wrapped (controlled) block: out = op(x @ w, controller * mask).

    x: (B, S, Din); w: (Din, H); controller: broadcastable to (1, 1, H);
    mask: (B, S) binary.  x/w are cast to `compute_dtype` (bf16 default) for
    the MXU; accumulation and the injection epilogue stay in f32.
    """
    B, S, Din = x.shape
    H = w.shape[1]
    M = B * S
    out_dtype = x.dtype

    compute_itemsize = jnp.dtype(compute_dtype).itemsize
    out_itemsize = jnp.dtype(out_dtype).itemsize
    vmem_cap = _vmem_capacity_bytes()

    tm, tk, m_pad, din_pad = _select_tiles(
        M, Din, H, compute_itemsize, out_itemsize, vmem_cap)

    # Flatten (B, S) -> M in the wrapper (free in XLA, avoids in-kernel
    # reshapes that can materialize VMEM copies across (8,128) tiles).
    x2 = x.reshape(M, Din)
    mask2 = mask.reshape(M, 1).astype(jnp.float32)
    ctrl2 = jnp.asarray(controller).reshape(1, H).astype(jnp.float32)
    w2 = w

    # Zero-pad ragged K (columns of x / rows of w contribute 0 to the matmul)
    # and ragged M (pad rows get mask=0 and are sliced off after the call).
    if din_pad != Din:
        x2 = jnp.pad(x2, ((0, 0), (0, din_pad - Din)))
        w2 = jnp.pad(w2, ((0, din_pad - Din), (0, 0)))
    if m_pad != M:
        x2 = jnp.pad(x2, ((0, m_pad - M), (0, 0)))
        mask2 = jnp.pad(mask2, ((0, m_pad - M), (0, 0)))

    x2 = x2.astype(compute_dtype)
    w2 = w2.astype(compute_dtype)

    grid = (m_pad // tm, din_pad // tk)

    need_bytes = _resident_bytes(tm, tk, H, compute_itemsize, out_itemsize)
    vmem_limit = int(min(max(int(need_bytes * 1.5), 16 * 1024 * 1024),
                         int(0.9 * vmem_cap)))

    kernel = functools.partial(_wrapped_block_kernel,
                               operator=operator, normalize=normalize)

    # W is re-streamed once per row tile -> account for it in bytes_accessed.
    bytes_accessed = int(
        (m_pad * din_pad + grid[0] * din_pad * H) * compute_itemsize
        + m_pad * H * out_itemsize
        + m_pad * 4 + H * 4)
    transcendentals = int(2 * m_pad) if normalize else 0

    out2 = pl.pallas_call(
        kernel,
        out_shape=jax.ShapeDtypeStruct((m_pad, H), out_dtype),
        grid_spec=pltpu.PrefetchScalarGridSpec(
            num_scalar_prefetch=0,
            grid=grid,
            in_specs=[
                pl.BlockSpec((tm, tk), lambda i, k: (i, k)),   # activations
                pl.BlockSpec((tk, H), lambda i, k: (k, 0)),    # block weight
                pl.BlockSpec((1, H), lambda i, k: (0, 0)),     # controller
                pl.BlockSpec((tm, 1), lambda i, k: (i, 0)),    # per-row mask
            ],
            out_specs=pl.BlockSpec((tm, H), lambda i, k: (i, 0)),
            scratch_shapes=[pltpu.VMEM((tm, H), jnp.float32)],
        ),
        compiler_params=pltpu.CompilerParams(
            dimension_semantics=("parallel", "arbitrary"),
            vmem_limit_bytes=vmem_limit),
        cost_estimate=pl.CostEstimate(
            flops=2 * m_pad * din_pad * H,
            transcendentals=transcendentals,
            bytes_accessed=bytes_accessed),
    )(x2, w2, ctrl2, mask2)

    return out2[:M].reshape(B, S, H)


# ----------------------------------------------------------------------------
# Glue (plain JAX): mask derivation from position_ids, exactly as in torch.
# ----------------------------------------------------------------------------
def mask_from_position_ids(position_ids):
    # zero_indices = (pos == 0).cumsum(1).argmax(1, keepdim=True)
    cs = jnp.cumsum((position_ids == 0).astype(jnp.int32), axis=1)
    zero_idx = jnp.argmax(cs, axis=1, keepdims=True)          # first max index
    col = jnp.arange(position_ids.shape[1])[None, :]
    return (col >= zero_idx).astype(jnp.float32)              # (B, S)


# ----------------------------------------------------------------------------
# Pure-JAX reference (mirrors WrappedBlock.forward with token_pos=None),
# using the same bf16-input matmul path as the kernel.
# ----------------------------------------------------------------------------
def _reference(x, w, controller, mask, *, operator, normalize,
               compute_dtype=jnp.bfloat16):
    xc = x.astype(compute_dtype).astype(jnp.float32)
    wc = w.astype(compute_dtype).astype(jnp.float32)
    y = jnp.einsum("bsd,dh->bsh", xc, wc)
    cm = (jnp.asarray(controller).reshape(1, 1, -1).astype(jnp.float32)
          * mask[..., None])
    norm_pre = jnp.sqrt(jnp.sum(y * y, axis=-1, keepdims=True))
    if operator == "linear_comb":
        mod = y + cm
    else:  # piecewise_linear
        sign = jnp.sign(jnp.sum(y * cm, axis=-1, keepdims=True))
        mod = y + cm * sign
    if normalize:
        norm_post = jnp.sqrt(jnp.sum(mod * mod, axis=-1, keepdims=True))
        mod = mod / norm_post * norm_pre
    return mod.astype(x.dtype)


if __name__ == "__main__":
    B, S, D_IN, H = 2, 8, 16, 32

    key = jax.random.PRNGKey(0)
    kx, kw, kc = jax.random.split(key, 3)

    # Deterministic synthetic inputs / parameters.
    x = jax.random.normal(kx, (B, S, D_IN), dtype=jnp.float32)
    w = jax.random.normal(kw, (D_IN, H), dtype=jnp.float32) * 0.1
    # Controller: 1-D reading vector -> reshape(1, 1, -1) as in WrappedBlock.
    controller = (jax.random.normal(kc, (H,), dtype=jnp.float32)
                  .reshape(1, 1, H))

    # position_ids with "padding" zeros at the start of batch 0.
    position_ids = jnp.array(
        [[0, 0, 0, 1, 2, 3, 4, 5],
         [0, 1, 2, 3, 4, 5, 6, 7]], dtype=jnp.int32)
    mask = mask_from_position_ids(position_ids)               # (B, S)

    ok = True
    for operator, normalize in [("linear_comb", False),
                                ("linear_comb", True),
                                ("piecewise_linear", False),
                                ("piecewise_linear", True)]:
        out = wrapped_block_forward(x, w, controller, mask,
                                    operator=operator, normalize=normalize)
        out = jax.block_until_ready(out)
        ref = _reference(x, w, controller, mask,
                         operator=operator, normalize=normalize)
        ok = ok and bool(jnp.allclose(out, ref, atol=1e-4, rtol=1e-4))

    if ok:
        print("KERNEL_OK")
    else:
        print("KERNEL_MISMATCH")
</pallas_src>

<mosaic_0001>
module attributes {stable_mosaic.version = 11 : i64} {
  func.func @_wrapped_block_kernel(%arg0: i32, %arg1: i32, %arg2: memref<16x16xbf16, #tpu.memory_space<vmem>>, %arg3: memref<16x32xbf16, #tpu.memory_space<vmem>>, %arg4: memref<1x32xf32, #tpu.memory_space<vmem>>, %arg5: memref<16x1xf32, #tpu.memory_space<vmem>>, %arg6: memref<16x32xf32, #tpu.memory_space<vmem>>, %arg7: memref<16x32xf32, #tpu.memory_space<vmem>>) attributes {dimension_semantics = [#tpu.dimension_semantics<parallel>, #tpu.dimension_semantics<arbitrary>], iteration_bounds = array<i64: 1, 1>, scalar_prefetch = 0 : i64, scratch_operands = 1 : i64, tpu.core_type = #tpu.core_type<tc>, window_params = [{transform_indices = @transform_0, window_bounds = array<i64: 16, 16>}, {transform_indices = @transform_1, window_bounds = array<i64: 16, 32>}, {pipeline_mode = #tpu.pipeline_mode<synchronous>, transform_indices = @transform_2, window_bounds = array<i64: 1, 32>}, {transform_indices = @transform_3, window_bounds = array<i64: 16, 1>}, {transform_indices = @transform_4, window_bounds = array<i64: 16, 32>}]} {
    %c0_i32 = arith.constant 0 : i32
    %0 = arith.cmpi eq, %arg1, %c0_i32 : i32
    %1 = arith.extui %0 : i1 to i32
    %c0_i32_0 = arith.constant 0 : i32
    %2 = arith.cmpi ne, %1, %c0_i32_0 : i32
    scf.if %2 {
      %cst_10 = arith.constant 0.000000e+00 : f32
      %12 = vector.broadcast %cst_10 : f32 to vector<16x32xf32>
      %c0_11 = arith.constant 0 : index
      %c0_12 = arith.constant 0 : index
      %13 = vector.load %arg7[%c0_11, %c0_12] : memref<16x32xf32, #tpu.memory_space<vmem>>, vector<16x32xf32>
      tpu.vector_store %arg7[%c0_11, %c0_12], %12 {strides = array<i32>} : memref<16x32xf32, #tpu.memory_space<vmem>>, vector<16x32xf32>,
    } else {
    }
    %c0 = arith.constant 0 : index
    %c0_1 = arith.constant 0 : index
    %3 = vector.load %arg7[%c0, %c0_1] : memref<16x32xf32, #tpu.memory_space<vmem>>, vector<16x32xf32>
    %c0_2 = arith.constant 0 : index
    %c0_3 = arith.constant 0 : index
    %4 = vector.load %arg2[%c0_2, %c0_3] : memref<16x16xbf16, #tpu.memory_space<vmem>>, vector<16x16xbf16>
    %c0_4 = arith.constant 0 : index
    %c0_5 = arith.constant 0 : index
    %5 = vector.load %arg3[%c0_4, %c0_5] : memref<16x32xbf16, #tpu.memory_space<vmem>>, vector<16x32xbf16>
    %cst = arith.constant dense<0.000000e+00> : vector<16x32xf32>
    %6 = tpu.matmul %4, %5, %cst {dimension_numbers = #tpu.dot_dimension_numbers<[1], [0], [0], [1], [0, 0, 1, 1], [], []>} : vector<16x16xbf16>, vector<16x32xbf16>, vector<16x32xf32> -> vector<16x32xf32>
    %7 = arith.addf %3, %6 : vector<16x32xf32>
    %c0_6 = arith.constant 0 : index
    %c0_7 = arith.constant 0 : index
    %8 = vector.load %arg7[%c0_6, %c0_7] : memref<16x32xf32, #tpu.memory_space<vmem>>, vector<16x32xf32>
    tpu.vector_store %arg7[%c0_6, %c0_7], %7 {strides = array<i32>} : memref<16x32xf32, #tpu.memory_space<vmem>>, vector<16x32xf32>,
    %c0_i32_8 = arith.constant 0 : i32
    %9 = arith.cmpi eq, %arg1, %c0_i32_8 : i32
    %10 = arith.extui %9 : i1 to i32
    %c0_i32_9 = arith.constant 0 : i32
    %11 = arith.cmpi ne, %10, %c0_i32_9 : i32
    scf.if %11 {
      %c0_10 = arith.constant 0 : index
      %c0_11 = arith.constant 0 : index
      %12 = vector.load %arg7[%c0_10, %c0_11] : memref<16x32xf32, #tpu.memory_space<vmem>>, vector<16x32xf32>
      %c0_12 = arith.constant 0 : index
      %c0_13 = arith.constant 0 : index
      %13 = vector.load %arg4[%c0_12, %c0_13] : memref<1x32xf32, #tpu.memory_space<vmem>>, vector<1x32xf32>
      %c0_14 = arith.constant 0 : index
      %c0_15 = arith.constant 0 : index
      %14 = vector.load %arg5[%c0_14, %c0_15] : memref<16x1xf32, #tpu.memory_space<vmem>>, vector<16x1xf32>
      %15 = vector.broadcast %13 : vector<1x32xf32> to vector<16x32xf32>
      %16 = vector.broadcast %14 : vector<16x1xf32> to vector<16x32xf32>
      %17 = arith.mulf %15, %16 : vector<16x32xf32>
      %18 = arith.addf %12, %17 : vector<16x32xf32>
      %c0_16 = arith.constant 0 : index
      %c0_17 = arith.constant 0 : index
      %19 = vector.load %arg6[%c0_16, %c0_17] : memref<16x32xf32, #tpu.memory_space<vmem>>, vector<16x32xf32>
      tpu.vector_store %arg6[%c0_16, %c0_17], %18 {strides = array<i32>} : memref<16x32xf32, #tpu.memory_space<vmem>>, vector<16x32xf32>,
    } else {
    }
    return
  }
  func.func @transform_0(%arg0: i32, %arg1: i32) -> (i32, i32) {
    %c0_i32 = arith.constant 0 : i32
    return %arg0, %arg1 : i32, i32
  }
  func.func @transform_1(%arg0: i32, %arg1: i32) -> (i32, i32) {
    %c0_i32 = arith.constant 0 : i32
    %c0_i32_0 = arith.constant 0 : i32
    return %arg1, %c0_i32 : i32, i32
  }
  func.func @transform_2(%arg0: i32, %arg1: i32) -> (i32, i32) {
    %c0_i32 = arith.constant 0 : i32
    %c0_i32_0 = arith.constant 0 : i32
    %c0_i32_1 = arith.constant 0 : i32
    return %c0_i32, %c0_i32_0 : i32, i32
  }
  func.func @transform_3(%arg0: i32, %arg1: i32) -> (i32, i32) {
    %c0_i32 = arith.constant 0 : i32
    %c0_i32_0 = arith.constant 0 : i32
    return %arg0, %c0_i32 : i32, i32
  }
  func.func @transform_4(%arg0: i32, %arg1: i32) -> (i32, i32) {
    %c0_i32 = arith.constant 0 : i32
    %c0_i32_0 = arith.constant 0 : i32
    return %arg0, %c0_i32 : i32, i32
  }
}

</mosaic_0001>

<bundles_post_ra>
// kernel: tpu_custom_call.1
= control target key start
LH: loop header
LB: loop body
LE: loop exit
PB: predicated region body
PF: predicated region fallthrough
CT: control target
= control target key end

     0   :  { %v155_v3 = vmov 0   ;;  %s209_s0 = inlined_call_operand.vmem [shape: bf16[16,16], index: 0, kind: input, shape index: {}]   ;;  %s210_s1 = inlined_call_operand.vmem [shape: bf16[16,32], index: 1, kind: input, shape index: {}]   ;;  %s211_s2 = inlined_call_operand.vmem [shape: f32[1,32], index: 2, kind: input, shape index: {}]   ;;  %s212_s3 = inlined_call_operand.vmem [shape: f32[16,1], index: 3, kind: input, shape index: {}]   ;;  %s213_s4 = inlined_call_operand.hbm [shape: f32[16,32], index: 4, kind: output, shape index: {}]  }
   0x1   :  { %v121_v0 = vld [vmem:[%s210_s1] sm:$0xff]  ;;  %127 = vset.pattern.permute.xlu0 %v155_v3 }
   0x2   :  { %v72_v1 = vld [vmem:[%s212_s3] sm:$0xff] }
   0x3   :  { %v120_v2 = vld [vmem:[%s209_s0] sm:$0xff] }
   0x4   :  { %9 = vsyncpa [#allocation4], 0  ;;  %54 = vmatpush.bf16.msra.mxu0 %v121_v0  ;;  %vm43_vm0 = vcmask 130048   ;;  %79 = vperm.xlu0 %127, %v72_v1   ;;  %v73_v4 = vld [vmem:[%s212_s3 + $0x8] sm:$0xff]  ;;  %vm23_vm1 = vcmask 261120   ;;  %v156_v5 = vmov 0.0  }
   0x5   :  { %24 = vst.msk [vmem:[#allocation2] sm:$0xff] %vm23_vm1, %v156_v5  ;;  %v128_v9 = vld [vmem:[%s211_s2] ss:$0 sm:$0xff]  ;;  %s157_s3 = smov [#allocation3]   ;;  %s99_s2 = sshll.u32 %s213_s4, 4  ;;  %s100_s2 = int_to_ptr.hbm [resolvable:$true] %s99_s2 }
   0x6   :  { %25 = vst.msk [vmem:[#allocation2 + $0x8] sm:$0xff] %vm23_vm1, %v156_v5  ;;  %s97_s23 = sshll.u32 %s157_s3, 4  ;;  %s158_s26 = smov 128   ;;  %s98_s23 = int_to_ptr.vmem [resolvable:$true] %s97_s23 }
   0x7   :  { %119 = vmatmul.msk.bf16.vlgmr.msra.gmra.mxu0 %vm43_vm0, %v120_v2  ;;  %s159_s27 = smov 8  }
   0xc   :  { %84 = vperm.xlu0 %127, %v73_v4   ;;  %v26_v6 = vld [vmem:[#allocation2] sm:$0xff] }
   0xd   :  { %v27_v11 = vld [vmem:[#allocation2 + $0x8] sm:$0xff] }
  0x76   :  { %v80_v10 = vpop.permute.xlu0 %79 }
  0x77   :  { %v87_v12 = vmul.f32 %v128_v9, %v80_v10 }
  0x7e   :  { %v85_v17 = vpop.permute.xlu0 %84 }
  0x7f   :  { %v88_v18 = vmul.f32 %v128_v9, %v85_v17 }
  0x84   :  { %v56_v7 = vpop.f32.mrf.mxu0 }
  0x85   :  { %v61_v8 = vadd.f32 %v56_v7, %v26_v6 }
  0x87   :  { %64 = vst.msk [vmem:[#allocation2] sm:$0xff] %vm23_vm1, %v61_v8 }
  0x8c   :  { %v58_v13 = vpop.f32.mrf.mxu0 }
  0x8d   :  { %v62_v14 = vadd.f32 %v58_v13, %v27_v11 }
  0x8e   :  { %v69_v15 = vld [vmem:[#allocation2] sm:$0xff] }
  0x8f   :  { %65 = vst.msk [vmem:[#allocation2 + $0x8] sm:$0xff] %vm23_vm1, %v62_v14  ;;  %v89_v16 = vadd.f32 %v87_v12, %v69_v15 }
  0x91   :  { %91 = vst.msk [vmem:[#allocation3] sm:$0xff] %vm23_vm1, %v89_v16 }
  0x96   :  { %v70_v19 = vld [vmem:[#allocation2 + $0x8] sm:$0xff] }
  0x97   :  { %v90_v20 = vadd.f32 %v88_v18, %v70_v19 }
  0x99   :  { %92 = vst.msk [vmem:[#allocation3 + $0x8] sm:$0xff] %vm23_vm1, %v90_v20 }
  0x9a   :  { %105 = dma.vmem_to_hbm [thread:$0]  %s98_s23, 256, %s100_s2, [#allocation4], %s158_s26, %s158_s26, %s159_s27  }
  0x9b   :  { %153 = dma.done.wait [#allocation4], 256  }
  0x9c   :  { %154 = vsyncadd [#allocation4], 4294967040 }
  0x9d   :  { %110 = vsyncpa [#allocation4], 1 }

</bundles_post_ra>
